<compile_context>
chip_gen: v7x
topology: tpu7x:2x2x1
jax: 0.10.0
libtpu: 0.0.40
codegen_flags: <defaults>
</compile_context>

<pallas_src>
import jax
import jax.numpy as jnp
from jax.experimental import pallas as pl
from jax.experimental.pallas import tpu as pltpu


def _attention_kernel(x_ref, w1_ref, b1_ref, w2_ref, o_ref):
    # x_ref:  (TB, S, D) tile of TB batch rows
    # w1_ref: (D, H), b1_ref: (1, H) f32, w2_ref: (1, H) f32 (W2 transposed row)
    # o_ref:  (TB, D)
    TB, S, D = x_ref.shape
    H = w1_ref.shape[1]

    x = x_ref[...]                                               # (TB, S, D)

    # ---- Linear1 + tanh: one (TB*S, D) @ (D, H) MXU matmul, f32 accumulate ----
    # Collapsing (TB, S) is a free relayout when S is a multiple of the sublane
    # packing (8 for f32, 16 for bf16); otherwise Mosaic inserts a small copy.
    x2d = x.reshape(TB * S, D)
    h = jnp.tanh(
        jnp.dot(x2d, w1_ref[...], preferred_element_type=jnp.float32)
        + b1_ref[...]
    )                                                            # (TB*S, H) f32

    # ---- Scores: VPU multiply + lane reduce over H (no width-1 MXU matmul).
    # b2 dropped: softmax shift-invariance.  Result is lane-dense (TB, S).
    h3 = h.reshape(TB, S, H)
    s = jnp.sum(h3 * w2_ref[...].reshape(1, 1, H), axis=-1)      # (TB, S) f32

    # ---- Softmax over the sequence axis (pool_dim=1), f32 math (v5e-safe) ----
    m = jnp.max(s, axis=-1, keepdims=True)                       # (TB, 1)
    e = jnp.exp(s - m)                                           # (TB, S)
    denom = jnp.sum(e, axis=-1, keepdims=True)                   # (TB, 1)
    p = e * pl.reciprocal(denom, approx=True)                    # (TB, S)

    # ---- Weighted sum over S with f32 accumulation ----
    ctx = jnp.sum(p[:, :, None] * x.astype(jnp.float32), axis=1)  # (TB, D)
    o_ref[...] = ctx.astype(o_ref.dtype)


def _choose_block_b(B, bytes_per_batch_row, target_block_bytes):
    """Largest TB whose x-tile is <= target_block_bytes, with >= 2 grid steps
    when B allows (both v7x TCs busy), preferring a TB that divides B (no
    ragged tail) and gives an even step count (clean megacore split)."""
    cap = max(1, int(target_block_bytes // max(1, bytes_per_batch_row)))
    cap = min(cap, B)
    if B >= 2:
        cap = min(cap, (B + 1) // 2)
    best_div = None
    for tb in range(cap, max(1, cap // 2) - 1, -1):
        if B % tb == 0:
            if best_div is None:
                best_div = tb
            if (B // tb) % 2 == 0:
                return tb
    if best_div is not None:
        return best_div
    return cap  # ragged last tile: OOB reads padded, OOB writes masked


def attention_forward(x, w1, b1, w2, b2=None, *, compute_dtype=jnp.bfloat16,
                      block_b=None, target_block_bytes=4 * 1024 * 1024):
    """x: (B, S, D); w1: (D, H); b1: (H,); w2: (H, 1); b2: (1,) (accepted for
    API parity; it cancels exactly inside the softmax).  Returns (B, D).

    compute_dtype: dtype of the big HBM stream (x) and W1 fed to the MXU
    (default bf16 -> ~2x on the memory-bound roofline); accumulation and
    softmax math stay float32.  Pass None for full f32.
    """
    B, S, D = x.shape
    H = w1.shape[1]
    out_dtype = x.dtype

    x_in = x if compute_dtype is None else x.astype(compute_dtype)
    w1_in = w1 if compute_dtype is None else w1.astype(compute_dtype)
    in_itemsize = jnp.dtype(x_in.dtype).itemsize
    out_itemsize = jnp.dtype(out_dtype).itemsize

    if block_b is None:
        TB = _choose_block_b(B, S * D * in_itemsize, target_block_bytes)
    else:
        TB = max(1, min(block_b, B))
    num_blocks = pl.cdiv(B, TB)
    # TODO(synk): if production S*D grows past the VMEM budget (esp. v7x 64 MiB),
    # add an "arbitrary" S-tiling axis with flash-style online softmax scratch.

    b1_2d = b1.reshape(1, H).astype(jnp.float32)
    w2_row = w2.reshape(1, H).astype(jnp.float32)   # (H, 1) -> lane-dense (1, H)

    # VMEM budget: double-buffered x/out tiles + weights + f32 intermediates
    # (h and the upcast weighted product) + slack.  Weights stay double-buffered
    # (tiny here) and are simply accounted for in the budget.
    x_tile = TB * S * D * in_itemsize
    out_tile = TB * D * out_itemsize
    w_bytes = D * H * in_itemsize + 2 * H * 4
    f32_tmp = TB * S * (H + D) * 4
    vmem_need = 2 * (x_tile + out_tile + w_bytes) + f32_tmp + (2 << 20)
    vmem_limit = int(min(max(vmem_need, 8 << 20), 48 << 20))

    # Advisory cost estimate (matmul + scores + weighted sum; tanh/exp on EUP).
    flops = 2 * B * S * D * H + 3 * B * S * H + 2 * B * S * D
    transcendentals = B * S * (H + 1)
    bytes_accessed = int(
        x_in.size * in_itemsize + w1_in.size * in_itemsize
        + (b1_2d.size + w2_row.size) * 4 + B * D * out_itemsize
    )

    out = pl.pallas_call(
        _attention_kernel,
        out_shape=jax.ShapeDtypeStruct((B, D), out_dtype),
        grid_spec=pltpu.PrefetchScalarGridSpec(
            num_scalar_prefetch=0,
            grid=(num_blocks,),
            in_specs=[
                pl.BlockSpec((TB, S, D), lambda b: (b, 0, 0)),   # x tile
                pl.BlockSpec((D, H), lambda b: (0, 0)),          # W1 (whole)
                pl.BlockSpec((1, H), lambda b: (0, 0)),          # b1
                pl.BlockSpec((1, H), lambda b: (0, 0)),          # W2 row
            ],
            out_specs=pl.BlockSpec((TB, D), lambda b: (b, 0)),
        ),
        compiler_params=pltpu.CompilerParams(
            dimension_semantics=("parallel",),
            vmem_limit_bytes=vmem_limit,
        ),
        cost_estimate=pl.CostEstimate(
            flops=flops,
            transcendentals=transcendentals,
            bytes_accessed=bytes_accessed,
        ),
    )(x_in, w1_in, b1_2d, w2_row)

    return out


def _reference(x, w1, b1, w2, b2):
    h = jnp.tanh(jnp.einsum("bsd,dh->bsh", x, w1) + b1)
    s = jnp.einsum("bsh,ho->bso", h, w2) + b2            # (B, S, 1)
    w = jax.nn.softmax(s, axis=1)
    return jnp.sum(w * x, axis=1)                        # (B, D)


if __name__ == "__main__":
    # Small demo shapes: D lane-dense (128), S a multiple of the bf16 sublane
    # packing (16), and B such that the auto-chosen TB=8 gives 2 grid steps
    # (both v7x TensorCores get work).
    B, S, D, H = 16, 16, 128, 32

    key = jax.random.PRNGKey(0)
    kx, k1, k2, k3, k4 = jax.random.split(key, 5)

    x = jax.random.normal(kx, (B, S, D), dtype=jnp.float32)
    # Math-friendly (in, out) layout: y = x @ W + b.
    w1 = jax.random.normal(k1, (D, H), dtype=jnp.float32) * 0.1
    b1 = jax.random.normal(k2, (H,), dtype=jnp.float32) * 0.1
    w2 = jax.random.normal(k3, (H, 1), dtype=jnp.float32) * 0.1
    b2 = jax.random.normal(k4, (1,), dtype=jnp.float32) * 0.1

    ref = _reference(x, w1, b1, w2, b2)

    # Full-f32 path (dtype parity with the PyTorch module).
    fwd_f32 = jax.jit(lambda *a: attention_forward(*a, compute_dtype=None))
    out_f32 = jax.block_until_ready(fwd_f32(x, w1, b1, w2, b2))
    assert out_f32.shape == (B, D), out_f32.shape
    assert jnp.allclose(out_f32, ref, atol=5e-3, rtol=5e-3), (
        f"f32 max abs diff {jnp.max(jnp.abs(out_f32 - ref))}"
    )

    # Default path: bf16 x/W1 stream (bandwidth win), f32 accumulation/softmax.
    fwd = jax.jit(lambda *a: attention_forward(*a))
    out = jax.block_until_ready(fwd(x, w1, b1, w2, b2))
    assert out.shape == (B, D), out.shape
    assert jnp.allclose(out, ref, atol=5e-2, rtol=5e-2), (
        f"bf16 max abs diff {jnp.max(jnp.abs(out - ref))}"
    )

    print("KERNEL_OK")
</pallas_src>

<mosaic_0001>
module attributes {stable_mosaic.version = 11 : i64} {
  func.func @_attention_kernel(%arg0: i32, %arg1: memref<8x16x128xf32, #tpu.memory_space<vmem>>, %arg2: memref<128x32xf32, #tpu.memory_space<vmem>>, %arg3: memref<1x32xf32, #tpu.memory_space<vmem>>, %arg4: memref<1x32xf32, #tpu.memory_space<vmem>>, %arg5: memref<8x128xf32, #tpu.memory_space<vmem>>) attributes {dimension_semantics = [#tpu.dimension_semantics<parallel>], iteration_bounds = array<i64: 2>, scalar_prefetch = 0 : i64, scratch_operands = 0 : i64, tpu.core_type = #tpu.core_type<tc>, window_params = [{transform_indices = @transform_0, window_bounds = array<i64: 8, 16, 128>}, {pipeline_mode = #tpu.pipeline_mode<synchronous>, transform_indices = @transform_1, window_bounds = array<i64: 128, 32>}, {pipeline_mode = #tpu.pipeline_mode<synchronous>, transform_indices = @transform_2, window_bounds = array<i64: 1, 32>}, {pipeline_mode = #tpu.pipeline_mode<synchronous>, transform_indices = @transform_3, window_bounds = array<i64: 1, 32>}, {transform_indices = @transform_4, window_bounds = array<i64: 8, 128>}]} {
    %c0 = arith.constant 0 : index
    %c0_0 = arith.constant 0 : index
    %c0_1 = arith.constant 0 : index
    %0 = vector.load %arg1[%c0, %c0_0, %c0_1] : memref<8x16x128xf32, #tpu.memory_space<vmem>>, vector<8x16x128xf32>
    %1 = vector.shape_cast %0 : vector<8x16x128xf32> to vector<128x128xf32>
    %c0_2 = arith.constant 0 : index
    %c0_3 = arith.constant 0 : index
    %2 = vector.load %arg2[%c0_2, %c0_3] : memref<128x32xf32, #tpu.memory_space<vmem>>, vector<128x32xf32>
    %cst = arith.constant dense<0.000000e+00> : vector<128x32xf32>
    %3 = tpu.matmul %1, %2, %cst {dimension_numbers = #tpu.dot_dimension_numbers<[1], [0], [0], [1], [0, 0, 1, 1], [], []>} : vector<128x128xf32>, vector<128x32xf32>, vector<128x32xf32> -> vector<128x32xf32>
    %c0_4 = arith.constant 0 : index
    %c0_5 = arith.constant 0 : index
    %4 = vector.load %arg3[%c0_4, %c0_5] : memref<1x32xf32, #tpu.memory_space<vmem>>, vector<1x32xf32>
    %5 = vector.broadcast %4 : vector<1x32xf32> to vector<128x32xf32>
    %6 = arith.addf %3, %5 : vector<128x32xf32>
    %7 = math.tanh %6 : vector<128x32xf32>
    %8 = vector.shape_cast %7 : vector<128x32xf32> to vector<8x16x32xf32>
    %c0_6 = arith.constant 0 : index
    %c0_7 = arith.constant 0 : index
    %9 = vector.load %arg4[%c0_6, %c0_7] : memref<1x32xf32, #tpu.memory_space<vmem>>, vector<1x32xf32>
    %10 = vector.shape_cast %9 : vector<1x32xf32> to vector<1x1x32xf32>
    %11 = vector.broadcast %10 : vector<1x1x32xf32> to vector<8x16x32xf32>
    %12 = arith.mulf %8, %11 : vector<8x16x32xf32>
    %cst_8 = arith.constant dense<0.000000e+00> : vector<8x16xf32>
    %13 = vector.multi_reduction <add>, %12, %cst_8 [2] : vector<8x16x32xf32> to vector<8x16xf32>
    %cst_9 = arith.constant dense<0xFF800000> : vector<8xf32>
    %14 = vector.multi_reduction <maximumf>, %13, %cst_9 [1] : vector<8x16xf32> to vector<8xf32>
    %15 = vector.shape_cast %14 : vector<8xf32> to vector<8x1xf32>
    %16 = vector.broadcast %15 : vector<8x1xf32> to vector<8x16xf32>
    %17 = arith.subf %13, %16 : vector<8x16xf32>
    %18 = math.exp %17 : vector<8x16xf32>
    %cst_10 = arith.constant dense<0.000000e+00> : vector<8xf32>
    %19 = vector.multi_reduction <add>, %18, %cst_10 [1] : vector<8x16xf32> to vector<8xf32>
    %20 = vector.shape_cast %19 : vector<8xf32> to vector<8x1xf32>
    %21 = tpu.reciprocal %20 {approx = true} : vector<8x1xf32> -> vector<8x1xf32>
    %22 = vector.broadcast %21 : vector<8x1xf32> to vector<8x16xf32>
    %23 = arith.mulf %18, %22 : vector<8x16xf32>
    %24 = vector.shape_cast %23 : vector<8x16xf32> to vector<8x16x1xf32>
    %25 = vector.broadcast %24 : vector<8x16x1xf32> to vector<8x16x128xf32>
    %26 = arith.mulf %25, %0 : vector<8x16x128xf32>
    %cst_11 = arith.constant dense<0.000000e+00> : vector<8x128xf32>
    %27 = vector.multi_reduction <add>, %26, %cst_11 [1] : vector<8x16x128xf32> to vector<8x128xf32>
    %c0_12 = arith.constant 0 : index
    %c0_13 = arith.constant 0 : index
    %28 = vector.load %arg5[%c0_12, %c0_13] : memref<8x128xf32, #tpu.memory_space<vmem>>, vector<8x128xf32>
    tpu.vector_store %arg5[%c0_12, %c0_13], %27 {strides = array<i32>} : memref<8x128xf32, #tpu.memory_space<vmem>>, vector<8x128xf32>,
    return
  }
  func.func @transform_0(%arg0: i32) -> (i32, i32, i32) {
    %c0_i32 = arith.constant 0 : i32
    %c0_i32_0 = arith.constant 0 : i32
    %c0_i32_1 = arith.constant 0 : i32
    return %arg0, %c0_i32, %c0_i32_0 : i32, i32, i32
  }
  func.func @transform_1(%arg0: i32) -> (i32, i32) {
    %c0_i32 = arith.constant 0 : i32
    %c0_i32_0 = arith.constant 0 : i32
    %c0_i32_1 = arith.constant 0 : i32
    return %c0_i32, %c0_i32_0 : i32, i32
  }
  func.func @transform_2(%arg0: i32) -> (i32, i32) {
    %c0_i32 = arith.constant 0 : i32
    %c0_i32_0 = arith.constant 0 : i32
    %c0_i32_1 = arith.constant 0 : i32
    return %c0_i32, %c0_i32_0 : i32, i32
  }
  func.func @transform_3(%arg0: i32) -> (i32, i32) {
    %c0_i32 = arith.constant 0 : i32
    %c0_i32_0 = arith.constant 0 : i32
    %c0_i32_1 = arith.constant 0 : i32
    return %c0_i32, %c0_i32_0 : i32, i32
  }
  func.func @transform_4(%arg0: i32) -> (i32, i32) {
    %c0_i32 = arith.constant 0 : i32
    %c0_i32_0 = arith.constant 0 : i32
    return %arg0, %c0_i32 : i32, i32
  }
}

</mosaic_0001>

<bundles_post_ra>
// kernel: _lambda_.1
= control target key start
LH: loop header
LB: loop body
LE: loop exit
PB: predicated region body
PF: predicated region fallthrough
CT: control target
= control target key end

     0   :  { %9 = vsyncpa [#allocation3], 0  ;;  %s2151_s0 = inlined_call_operand.hbm [shape: f32[16,16,128], index: 0, kind: input, shape index: {}]   ;;  %s2152_s1 = inlined_call_operand.vmem [shape: f32[128,32], index: 1, kind: input, shape index: {}]   ;;  %s2153_s2 = inlined_call_operand.vmem [shape: f32[1,32], index: 2, kind: input, shape index: {}]   ;;  %s2154_s3 = inlined_call_operand.vmem [shape: f32[1,32], index: 3, kind: input, shape index: {}]   ;;  %s2155_s4 = inlined_call_operand.hbm [shape: f32[16,128], index: 4, kind: output, shape index: {}]  }
   0x1   :  { %11 = vsyncpa [#allocation3 + $0x1], 0 }
   0x2   :  { %12 = vsyncpa [#allocation4], 0 }
   0x3   :  { %14 = vsyncpa [#allocation4 + $0x1], 0  ;;  %s1547_s15 = smov 0   ;;  %s1549_s16 = smov 0  }
   0x4   :  { %s1551_s17 = smov 0   ;;  %s1553_s18 = smov 0  }
   0x5 LB: > { %s1568_s19 = sadd.s32 4294967295, %s1515_s18   ;;  %s1148_s20 = sadd.s32 4294967294, %s1515_s18   ;;  %s1515_s18 = sphi %s1553_s18, %s2174_s18   ;;  %s1511_s17 = sphi %s1551_s17, %s2173_s17   ;;  %s1507_s16 = sphi %s1549_s16, %s2172_s16   ;;  %s1503_s15 = sphi %s1547_s15, %s2171_s15  }
   0x6   : > { %s1572_s21 = sadd.s32 1, %s1515_s18   ;;  %s27_s22 = sadd.s32 1, %s1511_s17 }
   0x7   : > { %s24_s23 = ssub.s32 %s1515_s18, %s1572_s21  ;;  %p34_p0 = scmp.ne.s32.totalorder %s1511_s17, %s1507_s16 }
   0x8   : > { %p25_p1 = scmp.eq.s32.totalorder %s24_s23, 0  ;;  %p35_p2 = scmp.eq.s32.totalorder %s1515_s18, 0 }
   0x9   : > { %p40_p3 = scmp.ne.s32.totalorder %s1507_s16, %s1503_s15  ;;  %p41_p4 = scmp.eq.s32.totalorder %s1568_s19, 0 }
   0xa   : > { %s1584_s24 = scalar_select %p25_p1, %s1511_s17, %s27_s22  }
   0xb   : > { %p1586_p5 = por %p35_p2, %p34_p0  ;;  %p1590_p6 = por %p41_p4, %p40_p3 }
   0xc   : > { %p127_p7 = scmp.eq.s32.totalorder %s1568_s19, 1  ;;  %p133_p8 = scmp.eq.s32.totalorder %s1148_s20, 1 }
   0xd   : > { %p1314_p10 = scmp.lt.s32.totalorder %s1515_s18, 2  ;;  %s162_s29 = sand.u32 1, %s1511_s17  }
   0xe   : > { %p1597_p11 = por %p127_p7, %p34_p0  ;;  %p1601_p12 = por %p133_p8, %p40_p3 }
   0xf   : > { %s1165_s30 = sshll.u32 %s1515_s18, 11  ;;  %s1151_s5 = sshll.u32 %s162_s29, 7 }
  0x10   : > { %s2162_s27 = scalar_select %p1597_p11, 1, 0 }
  0x11   : > { %s2163_s28 = scalar_select %p1601_p12, 1, 0 }
  0x12   : > { %s1610_s8 = scalar_lea.hbm %s2151_s0, %s1165_s30  ;;  %s166_s9 = scalar_lea.vmem [#allocation2], %s1151_s5 }
  0x13   : > { %s174_s10 = sshll.u32 %s166_s9, 4  ;;  %p1614_p13 = pnand %p1314_p10, %p1586_p5  ;;  %s1618_s10 = int_to_ptr.vmem [resolvable:$true] %s174_s10 }
  0x14   : > { %s1620_s12 = scalar_lea.sflag [#allocation3], %s162_s29  ;;  %s1419_s13 = scalar_lea.hbm %s1610_s8, 2048 }
  0x15   : > { %p1420_p0 = scmp.ne.s32.totalorder %s1610_s8, %s1419_s13  ;;  %p1421_p1 = pneg %p1614_p13 }
  0x16   : > { %s1424_s22 = scalar_lea.hbm %s2151_s0, 4096  ;;  %p1425_p4 = scmp.lt.u32.totalorder %s1610_s8, %s2151_s0 }
  0x17   : > { %p1422_p2 = pnand %p1421_p1, %p1420_p0  ;;  %p1426_p5 = scmp.lt.u32.totalorder %s1424_s22, %s1419_s13 }
  0x18   : > { %p1428_p8 = scmp.lt.u32.totalorder %s1419_s13, %s1610_s8 }
  0x19   : > { %p1423_p3 = pneg %p1422_p2  ;;  %p1427_p7 = por %p1426_p5, %p1425_p4 }
  0x1b   : > { %p1429_p10 = por %p1428_p8, %p1427_p7 }
  0x1d   : > { %p1430_p9 = pnand %p1429_p10, %p1423_p3 }
  0x1f   : > { %1433 = shalt.err (!%p1430_p9)
}
  0x20   : > { %s1434_s29 = scalar_lea.vmem %s1618_s10, 2048  ;;  %s1517_s30 = smov [#allocation2]  }
  0x21   : > { %p1435_p0 = scmp.ne.s32.totalorder %s1618_s10, %s1434_s29  ;;  %s1439_s5 = sshll.u32 %s1517_s30, 4  ;;  %s1440_s5 = int_to_ptr.vmem [resolvable:$false] %s1439_s5 }
  0x22   : > { %s1441_s6 = scalar_lea.vmem %s1440_s5, 4096  ;;  %p1442_p11 = scmp.lt.s32.totalorder %s1618_s10, %s1440_s5 }
  0x23   : > { %p1437_p2 = pnand %p1435_p0, %p1421_p1  ;;  %p1443_p4 = scmp.lt.s32.totalorder %s1441_s6, %s1434_s29 }
  0x25   : > { %p1438_p12 = pneg %p1437_p2  ;;  %p1444_p5 = por %p1443_p4, %p1442_p11 }
  0x27   : > { %p1445_p7 = pnand %p1444_p5, %p1438_p12 }
  0x29   : > { %1448 = shalt.err (!%p1445_p7)
}
  0x2a   : > { %s1518_s7 = smov 128   ;;  %s1519_s9 = smov 8  }
  0x2b   : > { %1309 = dma.hbm_to_vmem [thread:$0]  (!%p1614_p13), %s1610_s8, 2048, %s1618_s10, %s1620_s12, %s1518_s7, %s1518_s7, %s1519_s9  }
  0x2c   : > { %p1155_p9 = scmp.ge.s32.totalorder %s1515_s18, 1  ;;  %p182_p1 = scmp.lt.s32.totalorder %s1515_s18, 3 }
  0x2e   : > { %p183_p3 = pnand %p1155_p9, %p182_p1 }
  0x2f   : > { %s1651_s13 = sand.u32 (!%p183_p3), 1, %s1507_s16  }
  0x30   : > { %186 = sbr.rel (%p183_p3) target bundleno = 1199 (0x4af), region = 36  ;;  %s1156_s14 = sshll.u32 (!%p183_p3), %s1651_s13, 7 }
  0x31   : > { %s189_s20 = scalar_lea.sflag (!%p183_p3), [#allocation3], %s1651_s13  ;;  %s1655_s22 = scalar_lea.vmem (!%p183_p3), [#allocation2], %s1156_s14 }
  0x37   : > { %1494 = dma.done.wait (%p1590_p6), %s189_s20, 2048  }
  0x38   : > { %1496 = vsyncadd (%p1590_p6), %s189_s20, 4294965248  ;;  %v234_v0 = vld [vmem:[%s2152_s1] sm:$0xff]  ;;  %v235_v1 = vld [vmem:[%s2152_s1 + $0x8] sm:$0xff]  ;;  %vm441_vm0 = vcmask 261120   ;;  %vm517_vm1 = vcmask 130112   ;;  %vm582_vm2 = vcmask 1041409  }
  0x39   : > { %v236_v2 = vld [vmem:[%s2152_s1 + $0x10] sm:$0xff]  ;;  %v1254_v3 = vpack.c.bf16 %v235_v1, %v234_v0  ;;  %v237_v4 = vld [vmem:[%s2152_s1 + $0x18] sm:$0xff]  ;;  %v238_v6 = vld [vmem:[%s2152_s1 + $0x20] sm:$0xff]  ;;  %vm584_vm3 = vcmask 1042434   ;;  %vm586_vm4 = vcmask 1043459   ;;  %vm588_vm5 = vcmask 1044484  }
  0x3a   : > { %v1258_v5 = vpack.c.bf16 %v237_v4, %v236_v2  ;;  %v239_v7 = vld [vmem:[%s2152_s1 + $0x28] sm:$0xff]  ;;  %v1680_v9 = vld [vmem:[%s1655_s22] sm:$0xff]  ;;  %v240_v11 = vld [vmem:[%s2152_s1 + $0x30] sm:$0xff]  ;;  %vm590_vm6 = vcmask 1045509   ;;  %vm592_vm7 = vcmask 1046534   ;;  %vm594_vm8 = vcmask 1047559  }
  0x3b   : > { %1255 = vmatprep.subr.bf16.mxu0 %v1254_v3  ;;  %1286 = vmatprep.subr.bf16.mxu1 %v1254_v3  ;;  %v1262_v8 = vpack.c.bf16 %v239_v7, %v238_v6  ;;  %v1683_v10 = vld [vmem:[%s1655_s22 + $0x40] sm:$0xff]  ;;  %v241_v12 = vld [vmem:[%s2152_s1 + $0x38] sm:$0xff]  ;;  %v243_v15 = vld [vmem:[%s2152_s1 + $0x48] sm:$0xff]  ;;  %vm597_vm9 = vcmask 130048   ;;  %s1157_s25 = sshll.u32 %s1651_s13, 3  ;;  %s1161_s29 = sshll.u32 %s1568_s19, 7 }
  0x3c   : > { %1257 = vmatpush3.bf16.msra.mxu0 %v1254_v3  ;;  %1294 = vmatpush3.bf16.msra.mxu1 %v1254_v3  ;;  %v1266_v13 = vpack.c.bf16 %v241_v12, %v240_v11  ;;  %v242_v14 = vld [vmem:[%s2152_s1 + $0x40] sm:$0xff]  ;;  %v244_v17 = vld [vmem:[%s2152_s1 + $0x50] sm:$0xff]  ;;  %v245_v18 = vld [vmem:[%s2152_s1 + $0x58] sm:$0xff]  ;;  %s216_s30 = scalar_lea.vmem [#allocation5], %s1157_s25  ;;  %s2106_s7 = scalar_lea.hbm %s2155_s4, %s1161_s29 }
  0x3d   : > { %1259 = vmatprep.subr.bf16.mxu0 %v1258_v5  ;;  %1287 = vmatprep.subr.bf16.mxu1 %v1258_v5  ;;  %v1270_v16 = vpack.c.bf16 %v243_v15, %v242_v14  ;;  %v1274_v19 = vpack.c.bf16 %v245_v18, %v244_v17  ;;  %v246_v20 = vld [vmem:[%s2152_s1 + $0x60] sm:$0xff]  ;;  %v247_v21 = vld [vmem:[%s2152_s1 + $0x68] sm:$0xff]  ;;  %v248_v23 = vld [vmem:[%s2152_s1 + $0x70] sm:$0xff]  ;;  %s1078_s26 = sshll.u32 %s216_s30, 4  ;;  %s1065_s19 = scalar_lea.sflag [#allocation4], %s1651_s13  ;;  %s2108_s26 = int_to_ptr.vmem [resolvable:$true] %s1078_s26 }
  0x3e   : > { %1230 = vmatprep.mubr.f32.mxu0 %v1680_v9  ;;  %1242 = vmatprep.mubr.f32.mxu1 %v1683_v10  ;;  %v1278_v22 = vpack.c.bf16 %v247_v21, %v246_v20  ;;  %v249_v24 = vld [vmem:[%s2152_s1 + $0x78] sm:$0xff]  ;;  %v1718_v26 = vld [vmem:[%s1655_s22 + $0x8] sm:$0xff]  ;;  %v1724_v28 = vld [vmem:[%s1655_s22 + $0x10] sm:$0xff]  ;;  %s1449_s9 = scalar_lea.vmem %s2108_s26, 128  ;;  %p2168_p11 = scmp.ne.s32.totalorder %s2162_s27, 0 }
  0x3f   : > { %v1282_v25 = vpack.c.bf16 %v249_v24, %v248_v23  ;;  %v1721_v27 = vld [vmem:[%s1655_s22 + $0x48] sm:$0xff]  ;;  %v1727_v29 = vld [vmem:[%s1655_s22 + $0x50] sm:$0xff]  ;;  %v1733_v30 = vld [vmem:[%s1655_s22 + $0x18] sm:$0xff]  ;;  %p1450_p6 = scmp.ne.s32.totalorder %s2108_s26, %s1449_s9  ;;  %s1521_s14 = smov [#allocation5]  }
  0x40   : > { %1261 = vmatpush3.bf16.msra.mxu0 %v1258_v5  ;;  %1295 = vmatpush3.bf16.msra.mxu1 %v1258_v5  ;;  %v1737_v31 = vld [vmem:[%s1655_s22 + $0x58] sm:$0xff]  ;;  %v1740_v32 = vld [vmem:[%s1655_s22 + $0x20] sm:$0xff]  ;;  %v1749_v34 = vld [vmem:[%s1655_s22 + $0x28] sm:$0xff]  ;;  %s1453_s20 = sshll.u32 %s1521_s14, 4  ;;  %s1454_s20 = int_to_ptr.vmem [resolvable:$false] %s1453_s20 }
  0x41   : > { %1263 = vmatprep.subr.bf16.mxu0 %v1262_v8  ;;  %1288 = vmatprep.subr.bf16.mxu1 %v1262_v8  ;;  %v1743_v33 = vld [vmem:[%s1655_s22 + $0x60] sm:$0xff]  ;;  %v1753_v35 = vld [vmem:[%s1655_s22 + $0x68] sm:$0xff]  ;;  %v1756_v36 = vld [vmem:[%s1655_s22 + $0x30] sm:$0xff]  ;;  %p1451_p12 = pnand %p1450_p6, %p2168_p11  ;;  %s1455_s8 = scalar_lea.vmem %s1454_s20, 256 }
  0x42   : > { %v1759_v37 = vld [vmem:[%s1655_s22 + $0x70] sm:$0xff]  ;;  %v1765_v38 = vld [vmem:[%s1655_s22 + $0x38] sm:$0xff]  ;;  %v1776_v40 = vld [vmem:[%s2153_s2] ss:$0 sm:$0xff]  ;;  %p1456_p8 = scmp.lt.s32.totalorder %s2108_s26, %s1454_s20  ;;  %p1457_p10 = scmp.lt.s32.totalorder %s1455_s8, %s1449_s9 }
  0x43   : > { %v1769_v39 = vld [vmem:[%s1655_s22 + $0x78] sm:$0xff]  ;;  %v1791_v63 = vld [vmem:[%s2154_s3] ss:$0 sm:$0xff]  ;;  %p1452_p13 = pneg %p1451_p12 }
  0x44   : > { %1265 = vmatpush3.bf16.msra.mxu0 %v1262_v8  ;;  %1296 = vmatpush3.bf16.msra.mxu1 %v1262_v8  ;;  %p1458_p0 = por %p1457_p10, %p1456_p8 }
  0x45   : > { %1267 = vmatprep.subr.bf16.mxu0 %v1266_v13  ;;  %1289 = vmatprep.subr.bf16.mxu1 %v1266_v13 }
  0x46   : > { %p1459_p2 = pnand %p1458_p0, %p1452_p13 }
  0x48   : > { %1269 = vmatpush3.bf16.msra.mxu0 %v1266_v13  ;;  %1297 = vmatpush3.bf16.msra.mxu1 %v1266_v13 }
  0x49   : > { %1271 = vmatprep.subr.bf16.mxu0 %v1270_v16  ;;  %1290 = vmatprep.subr.bf16.mxu1 %v1270_v16 }
  0x4c   : > { %1273 = vmatpush3.bf16.msra.mxu0 %v1270_v16  ;;  %1298 = vmatpush3.bf16.msra.mxu1 %v1270_v16 }
  0x4d   : > { %1275 = vmatprep.subr.bf16.mxu0 %v1274_v19  ;;  %1291 = vmatprep.subr.bf16.mxu1 %v1274_v19 }
  0x50   : > { %1277 = vmatpush3.bf16.msra.mxu0 %v1274_v19  ;;  %1299 = vmatpush3.bf16.msra.mxu1 %v1274_v19 }
  0x51   : > { %1279 = vmatprep.subr.bf16.mxu0 %v1278_v22  ;;  %1292 = vmatprep.subr.bf16.mxu1 %v1278_v22 }
  0x54   : > { %1281 = vmatpush3.bf16.msra.mxu0 %v1278_v22  ;;  %1300 = vmatpush3.bf16.msra.mxu1 %v1278_v22 }
  0x55   : > { %1283 = vmatprep.subr.bf16.mxu0 %v1282_v25  ;;  %1293 = vmatprep.subr.bf16.mxu1 %v1282_v25 }
  0x58   : > { %1285 = vmatpush3.bf16.msra.mxu0 %v1282_v25  ;;  %1301 = vmatpush3.bf16.msra.mxu1 %v1282_v25 }
  0x5b   : > { %1231 = vmatmul.mubr.f32.vlgmr.msra.gmra.mrb[0].mxu0 %v1718_v26  ;;  %1243 = vmatmul.mubr.f32.vlgmr.msra.gmra.mrb[0].mxu1 %v1721_v27 }
  0x5c   : > { %1233 = vmatprep.mubr.f32.mxu0 %v1724_v28  ;;  %1245 = vmatprep.mubr.f32.mxu1 %v1727_v29 }
  0x5f   : > { %1234 = vmatmul.mubr.f32.gmra.mrb[2].mxu0 %v1733_v30  ;;  %1246 = vmatmul.mubr.f32.gmra.mrb[2].mxu1 %v1737_v31 }
  0x60   : > { %1236 = vmatprep.mubr.f32.mxu0 %v1740_v32  ;;  %1248 = vmatprep.mubr.f32.mxu1 %v1743_v33 }
  0x63   : > { %1237 = vmatmul.mubr.f32.gmra.mrb[4].mxu0 %v1749_v34  ;;  %1249 = vmatmul.mubr.f32.gmra.mrb[4].mxu1 %v1753_v35 }
  0x64   : > { %1239 = vmatprep.mubr.f32.mxu0 %v1756_v36  ;;  %1251 = vmatprep.mubr.f32.mxu1 %v1759_v37 }
  0x67   : > { %1240 = vmatmul.mubr.f32.gmra.mrb[6].mxu0 %v1765_v38  ;;  %1252 = vmatmul.mubr.f32.gmra.mrb[6].mxu1 %v1769_v39 }
 0x12e   : > { %v1232_v41 = vpop.f32.mrb[0].mxu0  ;;  %v1244_v42 = vpop.f32.mrb[0].mxu1 }
 0x12f   : > { %v329_v43 = vadd.f32 %v1232_v41, %v1776_v40  ;;  %v369_v44 = vadd.f32 %v1244_v42, %v1776_v40  ;;  %v323_v45 = vpop.f32.mrb[1].mxu0  ;;  %v363_v46 = vpop.f32.mrb[1].mxu1 }
 0x130   : > { %v324_v47 = vadd.f32 %v1776_v40, %v323_v45  ;;  %v364_v48 = vadd.f32 %v1776_v40, %v363_v46 }
 0x131   : > { %1353 = vtanh.f32 %v329_v43 }
 0x132   : > { %1355 = vtanh.f32 %v369_v44  ;;  %v1235_v49 = vpop.f32.mrb[2].mxu0  ;;  %v1247_v50 = vpop.f32.mrb[2].mxu1 }
 0x133   : > { %1357 = vtanh.f32 %v324_v47  ;;  %v339_v51 = vadd.f32 %v1235_v49, %v1776_v40  ;;  %v333_v52 = vpop.f32.mrb[3].mxu0  ;;  %v379_v53 = vadd.f32 %v1247_v50, %v1776_v40  ;;  %v373_v54 = vpop.f32.mrb[3].mxu1 }
 0x134   : > { %1359 = vtanh.f32 %v364_v48  ;;  %v374_v55 = vadd.f32 %v1776_v40, %v373_v54  ;;  %v334_v56 = vadd.f32 %v1776_v40, %v333_v52 }
 0x135   : > { %1361 = vtanh.f32 %v339_v51 }
 0x136   : > { %v1238_v57 = vpop.f32.mrb[4].mxu0  ;;  %v1250_v58 = vpop.f32.mrb[4].mxu1  ;;  %1363 = vtanh.f32 %v379_v53 }
 0x137   : > { %v343_v59 = vpop.f32.mrb[5].mxu0  ;;  %v383_v60 = vpop.f32.mrb[5].mxu1  ;;  %v349_v61 = vadd.f32 %v1238_v57, %v1776_v40  ;;  %1365 = vtanh.f32 %v374_v55  ;;  %v389_v8 = vadd.f32 %v1250_v58, %v1776_v40 }
 0x138   : > { %v344_v62 = vadd.f32 %v1776_v40, %v343_v59  ;;  %1367 = vtanh.f32 %v334_v56  ;;  %v384_v3 = vadd.f32 %v1776_v40, %v383_v60 }
 0x13a   : > { %v1241_v0 = vpop.f32.mrb[6].mxu0  ;;  %v1253_v1 = vpop.f32.mrb[6].mxu1  ;;  %1369 = vtanh.f32 %v344_v62 }
 0x13b   : > { %v1354_v2 = vpop.eup %1353  ;;  %v353_v4 = vpop.f32.mrb[7].mxu0  ;;  %1371 = vtanh.f32 %v349_v61  ;;  %v359_v20 = vadd.f32 %v1241_v0, %v1776_v40  ;;  %v399_v44 = vadd.f32 %v1253_v1, %v1776_v40 }
 0x13c   : > { %v393_v5 = vpop.f32.mrb[7].mxu1  ;;  %v1356_v6 = vpop.eup %1355  ;;  %v426_v7 = vmul.f32 %v1354_v2, %v1791_v63  ;;  %1373 = vtanh.f32 %v384_v3  ;;  %v354_v18 = vadd.f32 %v1776_v40, %v353_v4 }
 0x13d   : > { %v1358_v11 = vpop.eup %1357  ;;  %v434_v12 = vmul.f32 %v1356_v6, %v1791_v63  ;;  %1375 = vtanh.f32 %v389_v8  ;;  %v394_v42 = vadd.f32 %v1776_v40, %v393_v5 }
 0x13e   : > { %v1360_v13 = vpop.eup %1359  ;;  %v445_v14 = vsel %vm441_vm0, %v426_v7, 0.0  ;;  %v425_v15 = vmul.f32 %v1358_v11, %v1791_v63  ;;  %1377 = vtanh.f32 %v354_v18 }
 0x13f   : > { %v1362_v16 = vpop.eup %1361  ;;  %v469_v17 = vsel %vm441_vm0, %v434_v12, 0.0  ;;  %446 = vadd.xlane.f32.xlu0 %v445_v14  ;;  %v433_v25 = vmul.f32 %v1360_v13, %v1791_v63  ;;  %1379 = vtanh.f32 %v359_v20 }
 0x140   : > { %470 = vadd.xlane.f32.xlu1 %v469_v17  ;;  %v428_v19 = vmul.f32 %v1362_v16, %v1791_v63  ;;  %v1364_v21 = vpop.eup %1363  ;;  %v442_v23 = vsel %vm441_vm0, %v425_v15, 0.0  ;;  %1381 = vtanh.f32 %v394_v42  ;;  %v506_v17 = vlaneseq }
 0x141   : > { %v436_v24 = vmul.f32 %v1364_v21, %v1791_v63  ;;  %v1366_v41 = vpop.eup %1365  ;;  %v466_v48 = vsel %vm441_vm0, %v433_v25, 0.0  ;;  %1383 = vtanh.f32 %v399_v44 }
 0x142   : > { %v451_v22 = vsel %vm441_vm0, %v428_v19, 0.0  ;;  %v1368_v43 = vpop.eup %1367  ;;  %v435_v49 = vmul.f32 %v1366_v41, %v1791_v63  ;;  %v507_v19 = vand.u32 127, %v506_v17 }
 0x143   : > { %443 = vadd.xlane.f32.xlu0 %v442_v23  ;;  %v475_v46 = vsel %vm441_vm0, %v436_v24, 0.0  ;;  %v427_v50 = vmul.f32 %v1368_v43, %v1791_v63 }
 0x144   : > { %452 = vadd.xlane.f32.xlu1 %v451_v22  ;;  %v1370_v45 = vpop.eup %1369  ;;  %v472_v54 = vsel %vm441_vm0, %v435_v49, 0.0  ;;  %v1847_v22 = vshrl.u32 %v506_v17, 7  ;;  %v512_v23 = vadd.s32 4294967288, %v507_v19 }
 0x145   : > { %v1372_v47 = vpop.eup %1371  ;;  %v429_v51 = vmul.f32 %v1370_v45, %v1791_v63  ;;  %v448_v55 = vsel %vm441_vm0, %v427_v50, 0.0 }
 0x146   : > { %v1374_v52 = vpop.eup %1373  ;;  %v430_v53 = vmul.f32 %v1372_v47, %v1791_v63  ;;  %v1854_v41 = vsub.s32 %v507_v19, %v1847_v22  ;;  %v1857_v42 = vsub.s32 %v512_v23, %v1847_v22 }
 0x147   : > { %467 = vadd.xlane.f32.xlu0 %v466_v48  ;;  %v1376_v40 = vpop.eup %1375  ;;  %v454_v56 = vsel %vm441_vm0, %v429_v51, 0.0  ;;  %v437_v57 = vmul.f32 %v1374_v52, %v1791_v63 }
 0x148   : > { %476 = vadd.xlane.f32.xlu1 %v475_v46  ;;  %v1378_v58 = vpop.eup %1377  ;;  %v457_v59 = vsel %vm441_vm0, %v430_v53, 0.0  ;;  %v438_v60 = vmul.f32 %v1376_v40, %v1791_v63 }
 0x149   : > { %v1380_v61 = vpop.eup %1379  ;;  %v478_v62 = vsel %vm441_vm0, %v437_v57, 0.0  ;;  %v431_v0 = vmul.f32 %v1378_v58, %v1791_v63 }
 0x14a   : > { %v1382_v1 = vpop.eup %1381  ;;  %v481_v2 = vsel %vm441_vm0, %v438_v60, 0.0  ;;  %v432_v3 = vmul.f32 %v1380_v61, %v1791_v63 }
 0x14b   : > { %473 = vadd.xlane.f32.xlu0 %v472_v54  ;;  %v1384_v4 = vpop.eup %1383  ;;  %v460_v5 = vsel %vm441_vm0, %v431_v0, 0.0  ;;  %v439_v6 = vmul.f32 %v1382_v1, %v1791_v63 }
 0x14c   : > { %449 = vadd.xlane.f32.xlu1 %v448_v55  ;;  %v463_v7 = vsel %vm441_vm0, %v432_v3, 0.0  ;;  %v440_v8 = vmul.f32 %v1384_v4, %v1791_v63 }
 0x14d   : > { %v484_v11 = vsel %vm441_vm0, %v439_v6, 0.0 }
 0x14e   : > { %v487_v12 = vsel %vm441_vm0, %v440_v8, 0.0 }
 0x14f   : > { %455 = vadd.xlane.f32.xlu0 %v454_v56 }
 0x150   : > { %458 = vadd.xlane.f32.xlu1 %v457_v59 }
 0x153   : > { %479 = vadd.xlane.f32.xlu0 %v478_v62 }
 0x154   : > { %482 = vadd.xlane.f32.xlu1 %v481_v2 }
 0x157   : > { %461 = vadd.xlane.f32.xlu0 %v460_v5 }
 0x158   : > { %464 = vadd.xlane.f32.xlu1 %v463_v7 }
 0x15b   : > { %485 = vadd.xlane.f32.xlu0 %v484_v11 }
 0x15c   : > { %488 = vadd.xlane.f32.xlu1 %v487_v12 }
 0x1cc   : > { %v1831_v13 = vpop.xlane.xlu0 %446 }
 0x1cd   : > { %v1833_v14 = vpop.xlane.xlu1 %470  ;;  %v516_v50 = vrot.slane %v1831_v13, %v1857_v42 }
 0x1ce   : > { %v553_v59 = vrot.slane %v1833_v14, %v1857_v42 }
 0x1d0   : > { %v1835_v15 = vpop.xlane.xlu0 %443 }
 0x1d1   : > { %v1837_v16 = vpop.xlane.xlu1 %452  ;;  %v511_v49 = vrot.slane %v1835_v15, %v1854_v41 }
 0x1d2   : > { %v526_v48 = vrot.slane %v1837_v16, %v1857_v42 }
 0x1d3   : > { %v518_v56 = vsel %vm517_vm1, %v516_v50, %v511_v49  ;;  %v604_v49 = vsub.s32 0, %v1847_v22  ;;  %v608_v50 = vsub.s32 1, %v1847_v22 }
 0x1d4   : > { %v1839_v18 = vpop.xlane.xlu0 %467 }
 0x1d5   : > { %v1841_v63 = vpop.xlane.xlu1 %476  ;;  %v549_v53 = vrot.slane %v1839_v18, %v1854_v41 }
 0x1d6   : > { %v562_v0 = vrot.slane %v1841_v63, %v1857_v42 }
 0x1d7   : > { %v554_v4 = vsel %vm517_vm1, %v553_v59, %v549_v53 }
 0x1d8   : > { %v1843_v20 = vpop.xlane.xlu0 %473 }
 0x1d9   : > { %v1845_v21 = vpop.xlane.xlu1 %449  ;;  %v558_v57 = vrot.slane %v1843_v20, %v1854_v41 }
 0x1da   : > { %v522_v43 = vrot.slane %v1845_v21, %v1854_v41 }
 0x1db   : > { %v563_v8 = vsel %vm517_vm1, %v562_v0, %v558_v57 }
 0x1dc   : > { %v1849_v24 = vpop.xlane.xlu0 %455  ;;  %v527_v51 = vsel %vm517_vm1, %v526_v48, %v522_v43  ;;  %v1520_v48 = vmov 0  }
 0x1dd   : > { %v1851_v25 = vpop.xlane.xlu1 %458  ;;  %v531_v46 = vrot.slane %v1849_v24, %v1854_v41  ;;  %v583_v60 = vsel %vm582_vm2, %v527_v51, %v518_v56  ;;  %1352 = vset.pattern.permute.xlu0 %v1520_v48  ;;  %1351 = vset.pattern.permute.xlu1 %v1520_v48 }
 0x1de   : > { %v535_v45 = vrot.slane %v1851_v25, %v1857_v42 }
 0x1e0   : > { %v1861_v44 = vpop.xlane.xlu0 %479  ;;  %v536_v40 = vsel %vm517_vm1, %v535_v45, %v531_v46 }
 0x1e1   : > { %v1867_v47 = vpop.xlane.xlu1 %482  ;;  %v567_v62 = vrot.slane %v1861_v44, %v1854_v41  ;;  %v585_v1 = vsel %vm584_vm3, %v536_v40, %v583_v60  ;;  %v2157_v60 = vsub.s32 6, %v1847_v22 }
 0x1e2   : > { %v571_v61 = vrot.slane %v1867_v47, %v1857_v42 }
 0x1e4   : > { %v1876_v52 = vpop.xlane.xlu0 %461  ;;  %v572_v17 = vsel %vm517_vm1, %v571_v61, %v567_v62 }
 0x1e5   : > { %v1881_v54 = vpop.xlane.xlu1 %464  ;;  %v540_v55 = vrot.slane %v1876_v52, %v1854_v41 }
 0x1e6   : > { %v544_v58 = vrot.slane %v1881_v54, %v1857_v42 }
 0x1e8   : > { %v545_v2 = vsel %vm517_vm1, %v544_v58, %v540_v55  ;;  %v1901_v3 = vpop.xlane.xlu0 %485  ;;  %v2158_v55 = vsub.s32 5, %v1847_v22  ;;  %v612_v58 = vsub.s32 2, %v1847_v22 }
 0x1e9   : > { %v587_v5 = vsel %vm586_vm4, %v545_v2, %v585_v1  ;;  %v1905_v6 = vpop.xlane.xlu1 %488  ;;  %v576_v7 = vrot.slane %v1901_v3, %v1854_v41 }
 0x1ea   : > { %v580_v11 = vrot.slane %v1905_v6, %v1857_v42  ;;  %v589_v12 = vsel %vm588_vm5, %v554_v4, %v587_v5  ;;  %v2159_v5 = vsub.s32 3, %v1847_v22 }
 0x1eb   : > { %v591_v19 = vsel %vm590_vm6, %v563_v8, %v589_v12 }
 0x1ec   : > { %v581_v23 = vsel %vm517_vm1, %v580_v11, %v576_v7  ;;  %v593_v43 = vsel %vm592_vm7, %v572_v17, %v591_v19 }
 0x1ed   : > { %v595_v45 = vsel %vm594_vm8, %v581_v23, %v593_v43 }
 0x1ee   : > { %v598_v46 = vsel %vm597_vm9, %v595_v45, -inf }
 0x1ef   : > { %599 = vmax.xlane.f32.xlu0 %v598_v46 }
 0x27c   : > { %v600_v51 = vpop.xlane.xlu0 %599 }
 0x27d   : > { %v605_v53 = vrot.slane %v600_v51, %v604_v49  ;;  %v609_v40 = vrot.slane %v600_v51, %v608_v50  ;;  %v1933_v61 = vrot.slane %v600_v51, %v2158_v55  ;;  %v613_v1 = vrot.slane %v600_v51, %v612_v58 }
 0x27e   : > { %v617_v17 = vrot.slane %v600_v51, %v2159_v5 }
 0x27f   : > { %v642_v56 = vsub.f32 %v1835_v15, %v605_v53  ;;  %v643_v57 = vsub.f32 %v1831_v13, %v605_v53  ;;  %v644_v59 = vsub.f32 %v1845_v21, %v609_v40  ;;  %v645_v2 = vsub.f32 %v1837_v16, %v609_v40 }
 0x280   : > { %v632_v13 = vsub.s32 7, %v1847_v22  ;;  %v1941_v21 = vrot.slane %v600_v51, %v2157_v60  ;;  %v652_v4 = vsub.f32 %v1843_v20, %v1933_v61  ;;  %v646_v7 = vsub.f32 %v1849_v24, %v613_v1 }
 0x281   : > { %v658_v62 = vmul.f32 1.442695, %v642_v56  ;;  %v660_v0 = vmul.f32 1.442695, %v643_v57  ;;  %v662_v15 = vmul.f32 1.442695, %v644_v59  ;;  %v647_v19 = vsub.f32 %v1851_v25, %v613_v1 }
 0x282   : > { %v664_v8 = vmul.f32 1.442695, %v645_v2  ;;  %v633_v16 = vrot.slane %v600_v51, %v632_v13  ;;  %v654_v11 = vsub.f32 %v1861_v44, %v1941_v21  ;;  %v678_v12 = vmul.f32 1.442695, %v652_v4 }
 0x283   : > { %1385 = vpow2.f32 %v658_v62  ;;  %v666_v20 = vmul.f32 1.442695, %v646_v7  ;;  %v620_v44 = vsub.s32 4, %v1847_v22  ;;  %v648_v46 = vsub.f32 %v1876_v52, %v617_v17 }
 0x284   : > { %1387 = vpow2.f32 %v660_v0  ;;  %v656_v24 = vsub.f32 %v1901_v3, %v633_v16  ;;  %v682_v43 = vmul.f32 1.442695, %v654_v11  ;;  %v668_v48 = vmul.f32 1.442695, %v647_v19 }
 0x285   : > { %1389 = vpow2.f32 %v662_v15  ;;  %v621_v3 = vrot.slane %v600_v51, %v620_v44  ;;  %v649_v40 = vsub.f32 %v1881_v54, %v617_v17  ;;  %v670_v56 = vmul.f32 1.442695, %v648_v46 }
 0x286   : > { %1391 = vpow2.f32 %v664_v8  ;;  %v686_v53 = vmul.f32 1.442695, %v656_v24  ;;  %v653_v15 = vsub.f32 %v1841_v63, %v1933_v61 }
 0x287   : > { %1393 = vpow2.f32 %v678_v12  ;;  %v650_v59 = vsub.f32 %v1839_v18, %v621_v3  ;;  %v672_v62 = vmul.f32 1.442695, %v649_v40  ;;  %v651_v51 = vsub.f32 %v1833_v14, %v621_v3 }
 0x288   : > { %1395 = vpow2.f32 %v666_v20  ;;  %v655_v14 = vsub.f32 %v1867_v47, %v1941_v21  ;;  %v680_v8 = vmul.f32 1.442695, %v653_v15  ;;  %v657_v12 = vsub.f32 %v1905_v6, %v633_v16 }
 0x289   : > { %1397 = vpow2.f32 %v682_v43  ;;  %v674_v1 = vmul.f32 1.442695, %v650_v59  ;;  %v676_v4 = vmul.f32 1.442695, %v651_v51 }
 0x28a   : > { %1399 = vpow2.f32 %v668_v48  ;;  %v684_v63 = vmul.f32 1.442695, %v655_v14  ;;  %v688_v17 = vmul.f32 1.442695, %v657_v12 }
 0x28b   : > { %1401 = vpow2.f32 %v686_v53 }
 0x28c   : > { %1403 = vpow2.f32 %v670_v56 }
 0x28d   : > { %v1954_v23 = vpop.eup %1385  ;;  %1405 = vpow2.f32 %v672_v62 }
 0x28e   : > { %v1957_v45 = vpop.eup %1387  ;;  %707 = vperm.xlu1 %1351, %v1954_v23   ;;  %1407 = vpow2.f32 %v674_v1 }
 0x28f   : > { %710 = vperm.xlu0 %1352, %v1957_v45   ;;  %v1963_v25 = vpop.eup %1389  ;;  %1409 = vpow2.f32 %v676_v4 }
 0x290   : > { %v1969_v57 = vpop.eup %1391  ;;  %1411 = vpow2.f32 %v680_v8 }
 0x291   : > { %v1972_v52 = vpop.eup %1393  ;;  %1413 = vpow2.f32 %v684_v63 }
 0x292   : > { %713 = vperm.xlu1 %1351, %v1963_v25   ;;  %v1976_v0 = vpop.eup %1395  ;;  %1415 = vpow2.f32 %v688_v17 }
 0x293   : > { %737 = vperm.xlu0 %1352, %v1972_v52   ;;  %v1979_v54 = vpop.eup %1397 }
 0x294   : > { %v1983_v2 = vpop.eup %1399 }
 0x295   : > { %v1986_v18 = vpop.eup %1401 }
 0x296   : > { %716 = vperm.xlu1 %1351, %v1969_v57   ;;  %v1991_v7 = vpop.eup %1403 }
 0x297   : > { %743 = vperm.xlu0 %1352, %v1979_v54   ;;  %v1996_v11 = vpop.eup %1405 }
 0x298   : > { %v2000_v61 = vpop.eup %1407 }
 0x299   : > { %v2003_v19 = vpop.eup %1409 }
 0x29a   : > { %719 = vperm.xlu1 %1351, %v1976_v0   ;;  %v2006_v47 = vpop.eup %1411 }
 0x29b   : > { %749 = vperm.xlu0 %1352, %v1986_v18   ;;  %v2009_v21 = vpop.eup %1413 }
 0x29c   : > { %v2012_v6 = vpop.eup %1415 }
 0x29e   : > { %722 = vperm.xlu1 %1351, %v1983_v2  }
 0x2a2   : > { %725 = vperm.xlu1 %1351, %v1991_v7  }
 0x2a6   : > { %728 = vperm.xlu1 %1351, %v1996_v11  }
 0x2aa   : > { %731 = vperm.xlu1 %1351, %v2000_v61  }
 0x2ae   : > { %734 = vperm.xlu1 %1351, %v2003_v19  }
 0x2b2   : > { %740 = vperm.xlu1 %1351, %v2006_v47  }
 0x2b6   : > { %746 = vperm.xlu1 %1351, %v2009_v21  }
 0x2ba   : > { %752 = vperm.xlu1 %1351, %v2012_v6  }
 0x30d   : > { %v708_v16 = vpop.permute.xlu1 %707 }
 0x30e   : > { %v711_v53 = vpop.permute.xlu0 %710  ;;  %v757_v14 = vrot.slane %v708_v16, %v1854_v41 }
 0x30f   : > { %v761_v4 = vrot.slane %v711_v53, %v1857_v42 }
 0x311   : > { %v714_v20 = vpop.permute.xlu1 %713  ;;  %v762_v16 = vsel %vm517_vm1, %v761_v4, %v757_v14 }
 0x312   : > { %v738_v56 = vpop.permute.xlu0 %737  ;;  %v766_v8 = vrot.slane %v714_v20, %v1854_v41 }
 0x313   : > { %v802_v20 = vrot.slane %v738_v56, %v1854_v41 }
 0x315   : > { %v717_v24 = vpop.permute.xlu1 %716 }
 0x316   : > { %v770_v62 = vrot.slane %v717_v24, %v1857_v42  ;;  %v744_v51 = vpop.permute.xlu0 %743 }
 0x318   : > { %v771_v60 = vsel %vm517_vm1, %v770_v62, %v766_v8 }
 0x319   : > { %v720_v43 = vpop.permute.xlu1 %719  ;;  %v826_v62 = vsel %vm582_vm2, %v771_v60, %v762_v16 }
 0x31a   : > { %v775_v63 = vrot.slane %v720_v43, %v1854_v41 }
 0x31d   : > { %v723_v46 = vpop.permute.xlu1 %722 }
 0x31e   : > { %v779_v1 = vrot.slane %v723_v46, %v1857_v42 }
 0x320   : > { %v780_v46 = vsel %vm517_vm1, %v779_v1, %v775_v63 }
 0x321   : > { %v726_v48 = vpop.permute.xlu1 %725  ;;  %v827_v1 = vsel %vm584_vm3, %v780_v46, %v826_v62 }
 0x322   : > { %v784_v24 = vrot.slane %v726_v48, %v1854_v41  ;;  %v750_v48 = vpop.permute.xlu0 %749 }
 0x323   : > { %v820_v14 = vrot.slane %v750_v48, %v1854_v41  ;;  %v2167_v48 = vsub.s32 6, %v1847_v22 }
 0x325   : > { %v729_v3 = vpop.permute.xlu1 %728 }
 0x326   : > { %v788_v12 = vrot.slane %v729_v3, %v1857_v42 }
 0x328   : > { %v789_v3 = vsel %vm517_vm1, %v788_v12, %v784_v24 }
 0x329   : > { %v732_v40 = vpop.permute.xlu1 %731  ;;  %v828_v8 = vsel %vm586_vm4, %v789_v3, %v827_v1 }
 0x32a   : > { %v793_v53 = vrot.slane %v732_v40, %v1854_v41 }
 0x32d   : > { %v735_v59 = vpop.permute.xlu1 %734 }
 0x32e   : > { %v797_v17 = vrot.slane %v735_v59, %v1857_v42  ;;  %v811_v59 = vrot.slane %v744_v51, %v1854_v41 }
 0x331   : > { %v741_v15 = vpop.permute.xlu1 %740 }
 0x332   : > { %v806_v55 = vrot.slane %v741_v15, %v1857_v42  ;;  %v798_v15 = vsel %vm517_vm1, %v797_v17, %v793_v53 }
 0x334   : > { %v807_v40 = vsel %vm517_vm1, %v806_v55, %v802_v20 }
 0x335   : > { %v747_v5 = vpop.permute.xlu1 %746 }
 0x336   : > { %v815_v43 = vrot.slane %v747_v5, %v1857_v42  ;;  %v829_v5 = vsel %vm588_vm5, %v798_v15, %v828_v8 }
 0x337   : > { %v830_v60 = vsel %vm590_vm6, %v807_v40, %v829_v5 }
 0x338   : > { %v816_v4 = vsel %vm517_vm1, %v815_v43, %v811_v59 }
 0x339   : > { %v753_v56 = vpop.permute.xlu1 %752  ;;  %v831_v63 = vsel %vm592_vm7, %v816_v4, %v830_v60 }
 0x33a   : > { %v824_v51 = vrot.slane %v753_v56, %v1857_v42 }
 0x33c   : > { %v825_v12 = vsel %vm517_vm1, %v824_v51, %v820_v14 }
 0x33d   : > { %v832_v17 = vsel %vm594_vm8, %v825_v12, %v831_v63 }
 0x33e   : > { %v834_v55 = vsel %vm597_vm9, %v832_v17, 0.0 }
 0x33f   : > { %835 = vadd.xlane.f32.xlu0 %v834_v55 }
 0x3cc   : > { %v836_v24 = vpop.xlane.xlu0 %835 }
 0x3cd   : > { %1417 = vrcp.f32 %v836_v24 }
 0x3d7   : > { %v1418_v46 = vpop.eup %1417 }
 0x3d8   : > { %v858_v41 = vrot.slane %v1418_v46, %v620_v44  ;;  %v842_v42 = vrot.slane %v1418_v46, %v604_v49  ;;  %v870_v20 = vrot.slane %v1418_v46, %v632_v13  ;;  %v846_v59 = vrot.slane %v1418_v46, %v608_v50 }
 0x3d9   : > { %v866_v15 = vrot.slane %v1418_v46, %v2167_v48 }
 0x3da   : > { %v887_v53 = vmul.f32 %v2000_v61, %v858_v41  ;;  %v879_v16 = vmul.f32 %v1954_v23, %v842_v42  ;;  %v893_v3 = vmul.f32 %v1986_v18, %v870_v20  ;;  %v880_v43 = vmul.f32 %v1957_v45, %v842_v42 }
 0x3db   : > { %v881_v49 = vmul.f32 %v1963_v25, %v846_v59  ;;  %v882_v44 = vmul.f32 %v1969_v57, %v846_v59  ;;  %v850_v23 = vrot.slane %v1418_v46, %v612_v58  ;;  %v2165_v45 = vsub.s32 3, %v1847_v22 }
 0x3dc   : > { %937 = vperm.xlu0 %1352, %v887_v53   ;;  %897 = vperm.xlu1 %1351, %v879_v16   ;;  %v888_v57 = vmul.f32 %v2003_v19, %v858_v41  ;;  %v2166_v58 = vsub.s32 5, %v1847_v22  ;;  %v894_v19 = vmul.f32 %v2012_v6, %v870_v20 }
 0x3dd   : > { %v883_v13 = vmul.f32 %v1976_v0, %v850_v23  ;;  %v884_v18 = vmul.f32 %v1983_v2, %v850_v23  ;;  %v854_v61 = vrot.slane %v1418_v46, %v2165_v45 }
 0x3de   : > { %v862_v62 = vrot.slane %v1418_v46, %v2166_v58 }
 0x3df   : > { %v885_v50 = vmul.f32 %v1991_v7, %v854_v61  ;;  %v886_v25 = vmul.f32 %v1996_v11, %v854_v61  ;;  %v891_v7 = vmul.f32 %v1979_v54, %v866_v15  ;;  %v892_v11 = vmul.f32 %v2009_v21, %v866_v15 }
 0x3e0   : > { %967 = vperm.xlu0 %1352, %v893_v3   ;;  %902 = vperm.xlu1 %1351, %v880_v43   ;;  %v889_v0 = vmul.f32 %v1972_v52, %v862_v62  ;;  %v890_v2 = vmul.f32 %v2006_v47, %v862_v62 }
 0x3e4   : > { %907 = vperm.xlu1 %1351, %v881_v49  }
 0x3e8   : > { %912 = vperm.xlu1 %1351, %v882_v44  }
 0x3ec   : > { %917 = vperm.xlu1 %1351, %v883_v13  }
 0x3f0   : > { %922 = vperm.xlu1 %1351, %v884_v18  }
 0x3f4   : > { %927 = vperm.xlu1 %1351, %v885_v50  }
 0x3f8   : > { %932 = vperm.xlu1 %1351, %v886_v25  }
 0x3fc   : > { %942 = vperm.xlu1 %1351, %v888_v57  }
 0x400   : > { %947 = vperm.xlu1 %1351, %v889_v0  }
 0x404   : > { %952 = vperm.xlu1 %1351, %v890_v2  }
 0x408   : > { %957 = vperm.xlu1 %1351, %v891_v7  }
 0x40c   : > { %962 = vperm.xlu1 %1351, %v892_v11  }
 0x410   : > { %972 = vperm.xlu1 %1351, %v894_v19  }
 0x45b   : > { %v898_v1 = vpop.permute.xlu1 %897  ;;  %v938_v51 = vpop.permute.xlu0 %937 }
 0x45c   : > { %v975_v17 = vmul.f32 %v898_v1, %v1680_v9 }
 0x45f   : > { %v903_v40 = vpop.permute.xlu1 %902  ;;  %v968_v50 = vpop.permute.xlu0 %967 }
 0x460   : > { %v976_v21 = vmul.f32 %v903_v40, %v1718_v26  ;;  %v989_v48 = vmul.f32 %v968_v50, %v1759_v37 }
 0x462   : > { %v991_v41 = vadd.f32 %v976_v21, %v975_v17 }
 0x463   : > { %v908_v8 = vpop.permute.xlu1 %907 }
 0x464   : > { %v977_v60 = vmul.f32 %v908_v8, %v1724_v28 }
 0x467   : > { %v913_v52 = vpop.permute.xlu1 %912 }
 0x468   : > { %v978_v22 = vmul.f32 %v913_v52, %v1733_v30  ;;  %v983_v30 = vmul.f32 %v938_v51, %v1683_v10 }
 0x46a   : > { %v998_v55 = vadd.f32 %v978_v22, %v977_v60 }
 0x46b   : > { %v918_v4 = vpop.permute.xlu1 %917 }
 0x46c   : > { %v979_v12 = vmul.f32 %v918_v4, %v1740_v32  ;;  %v999_v53 = vrot.slane %v998_v55, 4 }
 0x46e   : > { %v1000_v3 = vadd.f32 %v999_v53, %v998_v55 }
 0x46f   : > { %v923_v56 = vpop.permute.xlu1 %922 }
 0x470   : > { %v980_v5 = vmul.f32 %v923_v56, %v1749_v34  ;;  %v1001_v13 = vrot.slane %v1000_v3, 2 }
 0x472   : > { %v1005_v34 = vadd.f32 %v980_v5, %v979_v12  ;;  %v1002_v62 = vadd.f32 %v1001_v13, %v1000_v3 }
 0x473   : > { %v928_v47 = vpop.permute.xlu1 %927 }
 0x474   : > { %v981_v24 = vmul.f32 %v928_v47, %v1756_v36  ;;  %v1006_v28 = vrot.slane %v1005_v34, 4  ;;  %v1003_v52 = vrot.slane %v1002_v62, 1 }
 0x476   : > { %v1007_v36 = vadd.f32 %v1006_v28, %v1005_v34  ;;  %v1004_v37 = vadd.f32 %v1003_v52, %v1002_v62 }
 0x477   : > { %v933_v14 = vpop.permute.xlu1 %932 }
 0x478   : > { %v982_v6 = vmul.f32 %v933_v14, %v1765_v38  ;;  %v992_v38 = vrot.slane %v991_v41, 4  ;;  %v1008_v45 = vrot.slane %v1007_v36, 2 }
 0x47a   : > { %v1012_v42 = vadd.f32 %v982_v6, %v981_v24  ;;  %v993_v10 = vadd.f32 %v992_v38, %v991_v41  ;;  %v1009_v15 = vadd.f32 %v1008_v45, %v1007_v36 }
 0x47b   : > { %v943_v54 = vpop.permute.xlu1 %942 }
 0x47c   : > { %v984_v63 = vmul.f32 %v943_v54, %v1721_v27  ;;  %v1013_v20 = vrot.slane %v1012_v42, 4  ;;  %v994_v25 = vrot.slane %v993_v10, 2 }
 0x47e   : > { %v1019_v26 = vadd.f32 %v984_v63, %v983_v30  ;;  %v1014_v49 = vadd.f32 %v1013_v20, %v1012_v42  ;;  %v995_v11 = vadd.f32 %v994_v25, %v993_v10 }
 0x47f   : > { %v948_v46 = vpop.permute.xlu1 %947 }
 0x480   : > { %v985_v32 = vmul.f32 %v948_v46, %v1727_v29  ;;  %v1020_v9 = vrot.slane %v1019_v26, 4  ;;  %v1015_v57 = vrot.slane %v1014_v49, 2  ;;  %v996_v47 = vrot.slane %v995_v11, 1 }
 0x482   : > { %v1021_v23 = vadd.f32 %v1020_v9, %v1019_v26  ;;  %v1016_v19 = vadd.f32 %v1015_v57, %v1014_v49 }
 0x483   : > { %v953_v16 = vpop.permute.xlu1 %952 }
 0x484   : > { %v986_v27 = vmul.f32 %v953_v16, %v1737_v31  ;;  %v1022_v58 = vrot.slane %v1021_v23, 2  ;;  %v1017_v14 = vrot.slane %v1016_v19, 1 }
 0x486   : > { %v1026_v43 = vadd.f32 %v986_v27, %v985_v32  ;;  %v1023_v8 = vadd.f32 %v1022_v58, %v1021_v23  ;;  %v1018_v12 = vadd.f32 %v1017_v14, %v1016_v19 }
 0x487   : > { %v958_v59 = vpop.permute.xlu1 %957 }
 0x488   : > { %v1027_v44 = vrot.slane %v1026_v43, 4  ;;  %v987_v29 = vmul.f32 %v958_v59, %v1743_v33  ;;  %v1024_v54 = vrot.slane %v1023_v8, 1 }
 0x48a   : > { %v1028_v18 = vadd.f32 %v1027_v44, %v1026_v43  ;;  %v1025_v55 = vadd.f32 %v1024_v54, %v1023_v8 }
 0x48b   : > { %v963_v61 = vpop.permute.xlu1 %962 }
 0x48c   : > { %v988_v31 = vmul.f32 %v963_v61, %v1753_v35  ;;  %v1029_v0 = vrot.slane %v1028_v18, 2  ;;  %v1010_v35 = vrot.slane %v1009_v15, 1 }
 0x48e   : > { %v1033_v2 = vadd.f32 %v988_v31, %v987_v29  ;;  %v1030_v4 = vadd.f32 %v1029_v0, %v1028_v18  ;;  %v1011_v6 = vadd.f32 %v1010_v35, %v1009_v15 }
 0x48f   : > { %v973_v7 = vpop.permute.xlu1 %972 }
 0x490   : > { %v1034_v1 = vrot.slane %v1033_v2, 4  ;;  %v990_v40 = vmul.f32 %v973_v7, %v1769_v39  ;;  %v1031_v51 = vrot.slane %v1030_v4, 1  ;;  %v997_v39 = vadd.f32 %v996_v47, %v995_v11 }
 0x492   : > { %v1035_v33 = vadd.f32 %v1034_v1, %v1033_v2  ;;  %v1040_v56 = vadd.f32 %v990_v40, %v989_v48  ;;  %v1055_v24 = vsel %vm582_vm2, %v1004_v37, %v997_v39  ;;  %v1032_v30 = vadd.f32 %v1031_v51, %v1030_v4 }
 0x493   : > { %v1056_v46 = vsel %vm584_vm3, %v1011_v6, %v1055_v24 }
 0x494   : > { %v1036_v22 = vrot.slane %v1035_v33, 2  ;;  %v1041_v5 = vrot.slane %v1040_v56, 4  ;;  %v1057_v42 = vsel %vm586_vm4, %v1018_v12, %v1056_v46 }
 0x495   : > { %v1058_v53 = vsel %vm588_vm5, %v1025_v55, %v1057_v42 }
 0x496   : > { %v1037_v21 = vadd.f32 %v1036_v22, %v1035_v33  ;;  %v1042_v60 = vadd.f32 %v1041_v5, %v1040_v56  ;;  %v1059_v16 = vsel %vm590_vm6, %v1032_v30, %v1058_v53 }
 0x498   : > { %v1038_v63 = vrot.slane %v1037_v21, 1  ;;  %v1043_v17 = vrot.slane %v1042_v60, 2 }
 0x49a   : > { %v1044_v34 = vadd.f32 %v1043_v17, %v1042_v60  ;;  %v1039_v41 = vadd.f32 %v1038_v63, %v1037_v21 }
 0x49c   : > { %v1045_v26 = vrot.slane %v1044_v34, 1  ;;  %v1060_v38 = vsel %vm592_vm7, %v1039_v41, %v1059_v16 }
 0x49e   : > { %v1046_v28 = vadd.f32 %v1045_v26, %v1044_v34 }
 0x4a0   : > { %v1061_v20 = vsel %vm594_vm8, %v1046_v28, %v1060_v38 }
 0x4a1   : > { %1063 = vst [vmem:[%s216_s30] sm:$0xff] %v1061_v20 }
 0x4a2   : > { %1462 = shalt.err (!%p1459_p2)
}
 0x4a3   : > { %s1463_s13 = scalar_lea.hbm %s2106_s7, 128  ;;  %s1467_s12 = scalar_lea.hbm %s2155_s4, 256 }
 0x4a4   : > { %p1464_p4 = scmp.ne.s32.totalorder %s2106_s7, %s1463_s13  ;;  %p1468_p9 = scmp.lt.u32.totalorder %s2106_s7, %s2155_s4 }
 0x4a5   : > { %p1469_p1 = scmp.lt.u32.totalorder %s1467_s12, %s1463_s13  ;;  %p1471_p6 = scmp.lt.u32.totalorder %s1463_s13, %s2106_s7 }
 0x4a6   : > { %p1465_p5 = pnand %p1464_p4, %p2168_p11 }
 0x4a7   : > { %p1470_p3 = por %p1469_p1, %p1468_p9 }
 0x4a8   : > { %p1466_p7 = pneg %p1465_p5 }
 0x4a9   : > { %p1472_p12 = por %p1471_p6, %p1470_p3 }
 0x4ab   : > { %p1473_p13 = pnand %p1472_p12, %p1466_p7 }
 0x4ad   : > { %1476 = shalt.err (!%p1473_p13)
}
 0x4ae   : > { %1304 = dma.vmem_to_hbm [thread:$0]  (%p2168_p11), %s2108_s26, 128, %s2106_s7, %s1065_s19  }
 0x4af PF: > { %s1090_s25 = sand.u32 1, %s1503_s15   ;;  %p2169_p8 = scmp.ne.s32.totalorder %s2163_s28, 0 }
 0x4b0   : > { %p2170_p10 = scmp.ge.s32.totalorder %s1515_s18, 2  ;;  %s1091_s29 = scalar_lea.sflag [#allocation4], %s1090_s25 }
 0x4b2   : > { %p1311_p0 = pnand %p2170_p10, %p2169_p8 }
 0x4b4   : > { %1498 = dma.done.wait (!%p1311_p0), %s1091_s29, 128  }
 0x4b5   : > { %1500 = vsyncadd (!%p1311_p0), %s1091_s29, 4294967168  ;;  %p17_p2 = scmp.ge.s32.totalorder %s1572_s21, 4   ;;  %s2171_s15 = smov %s1507_s16 }
 0x4b6   : > { %s2172_s16 = smov %s1511_s17  ;;  %s2173_s17 = smov %s1584_s24 }
 0x4b7   : > { %s2174_s18 = smov %s1572_s21  ;;  %19 = sbr.rel (!%p17_p2) target bundleno = 5 (0x5), region = 81 }
 0x4be   :  { %1096 = vsyncpa [#allocation3], 1 }
 0x4bf   :  { %1098 = vsyncpa [#allocation3 + $0x1], 1 }
 0x4c0   :  { %1099 = vsyncpa [#allocation4], 1 }
 0x4c1   :  { %1101 = vsyncpa [#allocation4 + $0x1], 1 }

</bundles_post_ra>
